<compile_context>
chip_gen: v7x
topology: tpu7x:2x2x1
jax: 0.10.0
libtpu: 0.0.40
codegen_flags: <defaults>
</compile_context>

<pallas_src>
import functools

import jax
import jax.numpy as jnp
import numpy as np
from jax.experimental import pallas as pl
from jax.experimental.pallas import tpu as pltpu


def _round_up(a, b):
    return -(-a // b) * b


def _charbonnier_kernel(x_ref, y_ref, w_ref, o_ref, acc_ref, *,
                        eps, m_total, k_total,
                        need_row_mask, need_col_mask, lane_chunk):
    """grid = (num_m, num_k); acc_ref is a small (tm, acc_l) f32 accumulator."""
    k_id = pl.program_id(1)

    @pl.when(k_id == 0)
    def _init():
        acc_ref[...] = jnp.zeros(acc_ref.shape, acc_ref.dtype)

    tm, tk = x_ref.shape
    acc_l = acc_ref.shape[1]
    eps2 = jnp.float32(eps * eps)

    # (tm, 1) per-row scale, broadcasts over lanes; computed once per grid step.
    w10 = w_ref[...].astype(jnp.float32) * jnp.float32(10.0)

    row_ok = None
    if need_row_mask:
        row = pl.program_id(0) * tm + jax.lax.broadcasted_iota(jnp.int32, (tm, 1), 0)
        row_ok = row < m_total
    col_base = k_id * tk

    # Process the large DMA'd block in lane chunks so f32 temporaries stay small.
    off = 0
    while off < tk:
        lc = min(lane_chunk, tk - off)
        xc = x_ref[:, off:off + lc].astype(jnp.float32)
        yc = y_ref[:, off:off + lc].astype(jnp.float32)
        d = (xc - yc) * w10
        v = jnp.sqrt(d * d + eps2)

        mask = None
        if need_col_mask:
            col = col_base + off + jax.lax.broadcasted_iota(jnp.int32, (1, lc), 1)
            mask = col < k_total
        if row_ok is not None:
            mask = row_ok if mask is None else (mask & row_ok)
        if mask is not None:
            v = jnp.where(mask, v, jnp.float32(0.0))

        # Fold lc lanes down to acc_l lanes with chained VALU adds (no XLU).
        s = v[:, 0:acc_l]
        for i in range(1, lc // acc_l):
            s = s + v[:, i * acc_l:(i + 1) * acc_l]
        acc_ref[...] += s
        off += lc

    @pl.when(k_id == pl.num_programs(1) - 1)
    def _finalize():
        # One small sublane reduce per M tile; output block is lane-dense.
        o_ref[...] = jnp.sum(acc_ref[...], axis=0, keepdims=True).reshape(o_ref.shape)


_TARGET_BLOCK_BYTES = 4 * 1024 * 1024   # per input block (x or y)
_MAX_TK = 4096
_MAX_TM = 2048
_LANE = 128
_VMEM_LIMIT_BYTES = 48 * 1024 * 1024    # fits v7x's 64 MiB physical VMEM


def weighted_charbonnier_loss(x, y, weights, eps: float = 1e-3):
    """x, y: (B, N, ...); weights reshapable to (B, N). Matches the torch module."""
    assert y.shape == x.shape
    B = x.shape[0]
    w = weights.reshape(B, -1)          # matches weights.view(batch, -1, 1, 1, 1)
    N = w.shape[1]
    assert x.ndim >= 2 and x.shape[1] == N

    M = B * N
    K = int(np.prod(x.shape[2:])) if x.ndim > 2 else 1

    # Keep original dtypes and layout — reshape is free, no padding of x/y.
    x2 = x.reshape(M, K)
    y2 = y.reshape(M, K)
    w2 = w.reshape(M, 1)

    itemsize = int(jnp.dtype(x.dtype).itemsize)

    # ---- lane (K) tile: large and 128-aligned; edge handled by in-kernel mask.
    if K < _LANE:
        tk = K                          # block dim == full array dim (allowed)
    else:
        tk = min(_round_up(K, _LANE), _MAX_TK)

    # ---- row (M) tile: sized so one block is ~4 MiB of input bytes.
    if M < 8:
        tm = M                          # block dim == full array dim (allowed)
    else:
        pref = 16 if itemsize == 2 else (32 if itemsize == 1 else 8)
        row_align = pref if M >= pref else 8
        tm_target = max(row_align, _TARGET_BLOCK_BYTES // (tk * itemsize))
        tm = min(_MAX_TM, tm_target, _round_up(M, row_align))
        tm = max(row_align, tm // row_align * row_align)
        # Prefer >= 2 row tiles so both v7x TensorCores get work.
        if tm >= M and M > row_align:
            tm = _round_up((M + 1) // 2, row_align)

    num_m = pl.cdiv(M, tm)
    num_k = pl.cdiv(K, tk)
    need_row_mask = (M % tm) != 0
    need_col_mask = (K % tk) != 0

    # f32 temporaries inside the kernel are (tm, lane_chunk); keep them <= 2 MiB.
    acc_l = min(_LANE, tk)
    lane_chunk = min(tk, 512)
    while lane_chunk > acc_l and tm * lane_chunk * 4 > (2 << 20):
        lane_chunk //= 2

    kernel = functools.partial(
        _charbonnier_kernel,
        eps=float(eps), m_total=M, k_total=K,
        need_row_mask=need_row_mask, need_col_mask=need_col_mask,
        lane_chunk=lane_chunk)

    partials = pl.pallas_call(
        kernel,
        out_shape=jax.ShapeDtypeStruct((num_m, 1, acc_l), jnp.float32),
        grid_spec=pltpu.PrefetchScalarGridSpec(
            num_scalar_prefetch=0,
            grid=(num_m, num_k),                       # reduction axis (k) last
            in_specs=[
                pl.BlockSpec((tm, tk), lambda m, k: (m, k)),
                pl.BlockSpec((tm, tk), lambda m, k: (m, k)),
                pl.BlockSpec((tm, 1), lambda m, k: (m, 0)),
            ],
            out_specs=pl.BlockSpec((1, 1, acc_l), lambda m, k: (m, 0, 0)),
            scratch_shapes=[pltpu.VMEM((tm, acc_l), jnp.float32)],
        ),
        compiler_params=pltpu.CompilerParams(
            dimension_semantics=("parallel", "arbitrary"),  # M tiles across cores
            vmem_limit_bytes=_VMEM_LIMIT_BYTES,
        ),
    )(x2, y2, w2)

    # Tiny finalize in the surrounding graph: sum per-M-tile partials, apply mean.
    return jnp.sum(partials) * np.float32(1.0 / (M * K))


def _reference_loss(x, y, weights, eps=1e-3):
    B = x.shape[0]
    w = weights.reshape(B, -1)[:, :, None, None, None].astype(jnp.float32)
    diff = (x.astype(jnp.float32) - y.astype(jnp.float32)) * 10.0 * w
    return jnp.mean(jnp.sqrt(diff * diff + eps * eps))


if __name__ == "__main__":
    key = jax.random.PRNGKey(0)
    kx, ky, kw = jax.random.split(key, 3)

    loss_fn = jax.jit(weighted_charbonnier_loss)

    # Test 1: aligned shapes (K = C*H*W = 1024), f32 inputs.
    B, N, C, H, W = 2, 4, 4, 16, 16
    x = jax.random.normal(kx, (B, N, C, H, W), dtype=jnp.float32)
    y = jax.random.normal(ky, (B, N, C, H, W), dtype=jnp.float32)
    weights = jax.random.uniform(kw, (B, N), dtype=jnp.float32)

    loss = jax.block_until_ready(loss_fn(x, y, weights))
    ref = jax.block_until_ready(_reference_loss(x, y, weights))
    assert np.allclose(np.asarray(loss), np.asarray(ref), rtol=1e-5, atol=1e-6), (loss, ref)

    # Test 2: non-aligned shapes (K = 3*15*17 = 765, M = 6) with bf16 inputs —
    # exercises the unpadded edge-block mask path and the in-kernel upcast.
    B2, N2, C2, H2, W2 = 2, 3, 3, 15, 17
    k1, k2, k3 = jax.random.split(jax.random.PRNGKey(1), 3)
    x2 = jax.random.normal(k1, (B2, N2, C2, H2, W2), dtype=jnp.bfloat16)
    y2 = jax.random.normal(k2, (B2, N2, C2, H2, W2), dtype=jnp.bfloat16)
    w2 = jax.random.uniform(k3, (B2, N2), dtype=jnp.float32)

    loss2 = jax.block_until_ready(loss_fn(x2, y2, w2))
    ref2 = jax.block_until_ready(_reference_loss(x2, y2, w2))
    assert np.allclose(np.asarray(loss2), np.asarray(ref2), rtol=1e-5, atol=1e-5), (loss2, ref2)

    print("KERNEL_OK")
</pallas_src>

<mosaic_0001>
module attributes {stable_mosaic.version = 11 : i64} {
  func.func @_charbonnier_kernel(%arg0: i32, %arg1: i32, %arg2: memref<8x1024xf32, #tpu.memory_space<vmem>>, %arg3: memref<8x1024xf32, #tpu.memory_space<vmem>>, %arg4: memref<8x1xf32, #tpu.memory_space<vmem>>, %arg5: memref<1x1x128xf32, #tpu.memory_space<vmem>>, %arg6: memref<8x128xf32, #tpu.memory_space<vmem>>) attributes {dimension_semantics = [#tpu.dimension_semantics<parallel>, #tpu.dimension_semantics<arbitrary>], iteration_bounds = array<i64: 1, 1>, scalar_prefetch = 0 : i64, scratch_operands = 1 : i64, tpu.core_type = #tpu.core_type<tc>, window_params = [{transform_indices = @transform_0, window_bounds = array<i64: 8, 1024>}, {transform_indices = @transform_1, window_bounds = array<i64: 8, 1024>}, {transform_indices = @transform_2, window_bounds = array<i64: 8, 1>}, {transform_indices = @transform_3, window_bounds = array<i64: 1, 1, 128>}]} {
    %c0_i32 = arith.constant 0 : i32
    %0 = arith.cmpi eq, %arg1, %c0_i32 : i32
    %1 = arith.extui %0 : i1 to i32
    %c0_i32_0 = arith.constant 0 : i32
    %2 = arith.cmpi ne, %1, %c0_i32_0 : i32
    scf.if %2 {
      %cst_21 = arith.constant 0.000000e+00 : f32
      %47 = vector.broadcast %cst_21 : f32 to vector<8x128xf32>
      %c0_22 = arith.constant 0 : index
      %c0_23 = arith.constant 0 : index
      %48 = vector.load %arg6[%c0_22, %c0_23] : memref<8x128xf32, #tpu.memory_space<vmem>>, vector<8x128xf32>
      tpu.vector_store %arg6[%c0_22, %c0_23], %47 {strides = array<i32>} : memref<8x128xf32, #tpu.memory_space<vmem>>, vector<8x128xf32>,
    } else {
    }
    %c0 = arith.constant 0 : index
    %c0_1 = arith.constant 0 : index
    %3 = vector.load %arg4[%c0, %c0_1] : memref<8x1xf32, #tpu.memory_space<vmem>>, vector<8x1xf32>
    %cst = arith.constant 1.000000e+01 : f32
    %4 = vector.broadcast %cst : f32 to vector<8x1xf32>
    %5 = arith.mulf %3, %4 : vector<8x1xf32>
    %c0_2 = arith.constant 0 : index
    %c0_3 = arith.constant 0 : index
    %6 = vector.load %arg2[%c0_2, %c0_3] : memref<8x1024xf32, #tpu.memory_space<vmem>>, vector<8x512xf32>
    %c0_4 = arith.constant 0 : index
    %c0_5 = arith.constant 0 : index
    %7 = vector.load %arg3[%c0_4, %c0_5] : memref<8x1024xf32, #tpu.memory_space<vmem>>, vector<8x512xf32>
    %8 = arith.subf %6, %7 : vector<8x512xf32>
    %9 = vector.broadcast %5 : vector<8x1xf32> to vector<8x512xf32>
    %10 = arith.mulf %8, %9 : vector<8x512xf32>
    %11 = arith.mulf %10, %10 : vector<8x512xf32>
    %cst_6 = arith.constant 9.99999997E-7 : f32
    %12 = vector.broadcast %cst_6 : f32 to vector<8x512xf32>
    %13 = arith.addf %11, %12 : vector<8x512xf32>
    %14 = math.sqrt %13 : vector<8x512xf32>
    %15 = vector.extract_strided_slice %14 {offsets = [0, 0], sizes = [8, 128], strides = [1, 1]} : vector<8x512xf32> to vector<8x128xf32>
    %16 = vector.extract_strided_slice %14 {offsets = [0, 128], sizes = [8, 128], strides = [1, 1]} : vector<8x512xf32> to vector<8x128xf32>
    %17 = arith.addf %15, %16 : vector<8x128xf32>
    %18 = vector.extract_strided_slice %14 {offsets = [0, 256], sizes = [8, 128], strides = [1, 1]} : vector<8x512xf32> to vector<8x128xf32>
    %19 = arith.addf %17, %18 : vector<8x128xf32>
    %20 = vector.extract_strided_slice %14 {offsets = [0, 384], sizes = [8, 128], strides = [1, 1]} : vector<8x512xf32> to vector<8x128xf32>
    %21 = arith.addf %19, %20 : vector<8x128xf32>
    %c0_7 = arith.constant 0 : index
    %c0_8 = arith.constant 0 : index
    %22 = vector.load %arg6[%c0_7, %c0_8] : memref<8x128xf32, #tpu.memory_space<vmem>>, vector<8x128xf32>
    %23 = arith.addf %22, %21 : vector<8x128xf32>
    %c0_9 = arith.constant 0 : index
    %c0_10 = arith.constant 0 : index
    %24 = vector.load %arg6[%c0_9, %c0_10] : memref<8x128xf32, #tpu.memory_space<vmem>>, vector<8x128xf32>
    tpu.vector_store %arg6[%c0_9, %c0_10], %23 {strides = array<i32>} : memref<8x128xf32, #tpu.memory_space<vmem>>, vector<8x128xf32>,
    %c0_11 = arith.constant 0 : index
    %c512 = arith.constant 512 : index
    %25 = vector.load %arg2[%c0_11, %c512] : memref<8x1024xf32, #tpu.memory_space<vmem>>, vector<8x512xf32>
    %c0_12 = arith.constant 0 : index
    %c512_13 = arith.constant 512 : index
    %26 = vector.load %arg3[%c0_12, %c512_13] : memref<8x1024xf32, #tpu.memory_space<vmem>>, vector<8x512xf32>
    %27 = arith.subf %25, %26 : vector<8x512xf32>
    %28 = vector.broadcast %5 : vector<8x1xf32> to vector<8x512xf32>
    %29 = arith.mulf %27, %28 : vector<8x512xf32>
    %30 = arith.mulf %29, %29 : vector<8x512xf32>
    %cst_14 = arith.constant 9.99999997E-7 : f32
    %31 = vector.broadcast %cst_14 : f32 to vector<8x512xf32>
    %32 = arith.addf %30, %31 : vector<8x512xf32>
    %33 = math.sqrt %32 : vector<8x512xf32>
    %34 = vector.extract_strided_slice %33 {offsets = [0, 0], sizes = [8, 128], strides = [1, 1]} : vector<8x512xf32> to vector<8x128xf32>
    %35 = vector.extract_strided_slice %33 {offsets = [0, 128], sizes = [8, 128], strides = [1, 1]} : vector<8x512xf32> to vector<8x128xf32>
    %36 = arith.addf %34, %35 : vector<8x128xf32>
    %37 = vector.extract_strided_slice %33 {offsets = [0, 256], sizes = [8, 128], strides = [1, 1]} : vector<8x512xf32> to vector<8x128xf32>
    %38 = arith.addf %36, %37 : vector<8x128xf32>
    %39 = vector.extract_strided_slice %33 {offsets = [0, 384], sizes = [8, 128], strides = [1, 1]} : vector<8x512xf32> to vector<8x128xf32>
    %40 = arith.addf %38, %39 : vector<8x128xf32>
    %c0_15 = arith.constant 0 : index
    %c0_16 = arith.constant 0 : index
    %41 = vector.load %arg6[%c0_15, %c0_16] : memref<8x128xf32, #tpu.memory_space<vmem>>, vector<8x128xf32>
    %42 = arith.addf %41, %40 : vector<8x128xf32>
    %c0_17 = arith.constant 0 : index
    %c0_18 = arith.constant 0 : index
    %43 = vector.load %arg6[%c0_17, %c0_18] : memref<8x128xf32, #tpu.memory_space<vmem>>, vector<8x128xf32>
    tpu.vector_store %arg6[%c0_17, %c0_18], %42 {strides = array<i32>} : memref<8x128xf32, #tpu.memory_space<vmem>>, vector<8x128xf32>,
    %c0_i32_19 = arith.constant 0 : i32
    %44 = arith.cmpi eq, %arg1, %c0_i32_19 : i32
    %45 = arith.extui %44 : i1 to i32
    %c0_i32_20 = arith.constant 0 : i32
    %46 = arith.cmpi ne, %45, %c0_i32_20 : i32
    scf.if %46 {
      %c0_21 = arith.constant 0 : index
      %c0_22 = arith.constant 0 : index
      %47 = vector.load %arg6[%c0_21, %c0_22] : memref<8x128xf32, #tpu.memory_space<vmem>>, vector<8x128xf32>
      %cst_23 = arith.constant dense<0.000000e+00> : vector<128xf32>
      %48 = vector.multi_reduction <add>, %47, %cst_23 [0] : vector<8x128xf32> to vector<128xf32>
      %49 = vector.shape_cast %48 : vector<128xf32> to vector<1x128xf32>
      %50 = vector.shape_cast %49 : vector<1x128xf32> to vector<1x1x128xf32>
      %c0_24 = arith.constant 0 : index
      %c0_25 = arith.constant 0 : index
      %c0_26 = arith.constant 0 : index
      %51 = vector.load %arg5[%c0_24, %c0_25, %c0_26] : memref<1x1x128xf32, #tpu.memory_space<vmem>>, vector<1x1x128xf32>
      tpu.vector_store %arg5[%c0_24, %c0_25, %c0_26], %50 {strides = array<i32>} : memref<1x1x128xf32, #tpu.memory_space<vmem>>, vector<1x1x128xf32>,
    } else {
    }
    return
  }
  func.func @transform_0(%arg0: i32, %arg1: i32) -> (i32, i32) {
    %c0_i32 = arith.constant 0 : i32
    return %arg0, %arg1 : i32, i32
  }
  func.func @transform_1(%arg0: i32, %arg1: i32) -> (i32, i32) {
    %c0_i32 = arith.constant 0 : i32
    return %arg0, %arg1 : i32, i32
  }
  func.func @transform_2(%arg0: i32, %arg1: i32) -> (i32, i32) {
    %c0_i32 = arith.constant 0 : i32
    %c0_i32_0 = arith.constant 0 : i32
    return %arg0, %c0_i32 : i32, i32
  }
  func.func @transform_3(%arg0: i32, %arg1: i32) -> (i32, i32, i32) {
    %c0_i32 = arith.constant 0 : i32
    %c0_i32_0 = arith.constant 0 : i32
    %c0_i32_1 = arith.constant 0 : i32
    return %arg0, %c0_i32, %c0_i32_0 : i32, i32, i32
  }
}

</mosaic_0001>

<bundles_post_ra>
// kernel: weighted_charbonnier_loss.1
= control target key start
LH: loop header
LB: loop body
LE: loop exit
PB: predicated region body
PF: predicated region fallthrough
CT: control target
= control target key end

     0   :  { %v175_v0 = vmov 0   ;;  %s285_s2 = inlined_call_operand.vmem [shape: f32[8,1], index: 2, kind: input, shape index: {}]   ;;  %s286_s0 = inlined_call_operand.vmem [shape: f32[8,1024], index: 0, kind: input, shape index: {}]   ;;  %s287_s1 = inlined_call_operand.vmem [shape: f32[8,1024], index: 1, kind: input, shape index: {}]   ;;  %s288_s3 = inlined_call_operand.vmem [shape: f32[1,1,128], index: 3, kind: output, shape index: {}]  }
   0x1   :  { %158 = vset.pattern.permute.xlu0 %v175_v0  ;;  %v19_v1 = vld [vmem:[%s285_s2] sm:$0xff]  ;;  %v22_v4 = vld [vmem:[%s286_s0 + $0x8] sm:$0xff]  ;;  %v23_v5 = vld [vmem:[%s286_s0 + $0x10] sm:$0xff] }
   0x2   :  { %v20_v2 = vmul.f32 10.0, %v19_v1  ;;  %v21_v3 = vld [vmem:[%s286_s0] sm:$0xff]  ;;  %v24_v6 = vld [vmem:[%s286_s0 + $0x18] sm:$0xff]  ;;  %v26_v8 = vld [vmem:[%s287_s1 + $0x8] sm:$0xff] }
   0x3   :  { %v25_v7 = vld [vmem:[%s287_s1] sm:$0xff]  ;;  %v27_v9 = vld [vmem:[%s287_s1 + $0x10] sm:$0xff]  ;;  %v28_v10 = vld [vmem:[%s287_s1 + $0x18] sm:$0xff]  ;;  %v30_v20 = vsub.f32 %v22_v4, %v26_v8 }
   0x4   :  { %35 = vperm.xlu0 %158, %v20_v2   ;;  %v84_v11 = vld [vmem:[%s286_s0 + $0x20] sm:$0xff]  ;;  %v85_v12 = vld [vmem:[%s286_s0 + $0x28] sm:$0xff]  ;;  %v86_v13 = vld [vmem:[%s286_s0 + $0x30] sm:$0xff]  ;;  %v29_v19 = vsub.f32 %v21_v3, %v25_v7  ;;  %v31_v21 = vsub.f32 %v23_v5, %v27_v9  ;;  %v32_v22 = vsub.f32 %v24_v6, %v28_v10 }
   0x5   :  { %v87_v14 = vld [vmem:[%s286_s0 + $0x38] sm:$0xff]  ;;  %v88_v15 = vld [vmem:[%s287_s1 + $0x20] sm:$0xff]  ;;  %v89_v16 = vld [vmem:[%s287_s1 + $0x28] sm:$0xff] }
   0x6   :  { %v90_v17 = vld [vmem:[%s287_s1 + $0x30] sm:$0xff]  ;;  %v91_v18 = vld [vmem:[%s287_s1 + $0x38] sm:$0xff]  ;;  %v92_v23 = vsub.f32 %v84_v11, %v88_v15  ;;  %v93_v24 = vsub.f32 %v85_v12, %v89_v16 }
   0x7   :  { %v94_v25 = vsub.f32 %v86_v13, %v90_v17  ;;  %v95_v26 = vsub.f32 %v87_v14, %v91_v18 }
  0x83   :  { %v36_v27 = vpop.permute.xlu0 %35 }
  0x84   :  { %v38_v28 = vmul.f32 %v36_v27, %v29_v19  ;;  %v39_v29 = vmul.f32 %v36_v27, %v30_v20  ;;  %v40_v30 = vmul.f32 %v36_v27, %v31_v21  ;;  %v41_v31 = vmul.f32 %v36_v27, %v32_v22 }
  0x85   :  { %v96_v32 = vmul.f32 %v92_v23, %v36_v27  ;;  %v97_v33 = vmul.f32 %v93_v24, %v36_v27  ;;  %v98_v34 = vmul.f32 %v94_v25, %v36_v27  ;;  %v99_v35 = vmul.f32 %v95_v26, %v36_v27 }
  0x86   :  { %v42_v36 = vmul.f32 %v38_v28, %v38_v28  ;;  %v43_v37 = vmul.f32 %v39_v29, %v39_v29  ;;  %v44_v38 = vmul.f32 %v40_v30, %v40_v30  ;;  %v45_v39 = vmul.f32 %v41_v31, %v41_v31 }
  0x87   :  { %v100_v40 = vmul.f32 %v96_v32, %v96_v32  ;;  %v101_v41 = vmul.f32 %v97_v33, %v97_v33  ;;  %v102_v46 = vmul.f32 %v98_v34, %v98_v34  ;;  %v103_v47 = vmul.f32 %v99_v35, %v99_v35 }
  0x88   :  { %v46_v42 = vadd.f32 1e-06, %v42_v36  ;;  %v47_v43 = vadd.f32 1e-06, %v43_v37  ;;  %v48_v44 = vadd.f32 1e-06, %v44_v38 }
  0x89   :  { %v247_v45 = vadd.f32 1e-06, %v45_v39  ;;  %v104_v48 = vadd.f32 1e-06, %v100_v40  ;;  %v105_v49 = vadd.f32 1e-06, %v101_v41 }
  0x8a   :  { %159 = vrsqrt.f32 %v46_v42  ;;  %v250_v50 = vadd.f32 1e-06, %v102_v46  ;;  %v252_v51 = vadd.f32 1e-06, %v103_v47  ;;  %vm52_vm0 = vcmp.eq.f32.partialorder %v46_v42, inf }
  0x8b   :  { %161 = vrsqrt.f32 %v47_v43  ;;  %vm54_vm1 = vcmp.eq.f32.partialorder %v46_v42, 0.0  ;;  %v55_v53 = vand.u32 2147483648, %v46_v42  ;;  %vm59_vm2 = vcmp.eq.f32.partialorder %v47_v43, inf }
  0x8c   :  { %163 = vrsqrt.f32 %v48_v44  ;;  %vm61_vm3 = vcmp.eq.f32.partialorder %v47_v43, 0.0  ;;  %v62_v54 = vand.u32 2147483648, %v47_v43  ;;  %vm66_vm4 = vcmp.eq.f32.partialorder %v48_v44, inf }
  0x8d   :  { %165 = vrsqrt.f32 %v247_v45  ;;  %vm68_vm5 = vcmp.eq.f32.partialorder %v48_v44, 0.0  ;;  %v69_v57 = vand.u32 2147483648, %v48_v44  ;;  %vm73_vm6 = vcmp.eq.f32.partialorder %v247_v45, inf }
  0x8e   :  { %167 = vrsqrt.f32 %v104_v48  ;;  %v76_v60 = vand.u32 2147483648, %v247_v45  ;;  %vm110_vm7 = vcmp.eq.f32.partialorder %v104_v48, inf  ;;  %vm112_vm8 = vcmp.eq.f32.partialorder %v104_v48, 0.0 }
  0x8f   :  { %169 = vrsqrt.f32 %v105_v49  ;;  %v113_v0 = vand.u32 2147483648, %v104_v48  ;;  %vm117_vm9 = vcmp.eq.f32.partialorder %v105_v49, inf  ;;  %vm119_vm10 = vcmp.eq.f32.partialorder %v105_v49, 0.0 }
  0x90   :  { %171 = vrsqrt.f32 %v250_v50  ;;  %v120_v12 = vand.u32 2147483648, %v105_v49  ;;  %vm124_vm11 = vcmp.eq.f32.partialorder %v250_v50, inf  ;;  %v127_v24 = vand.u32 2147483648, %v250_v50 }
  0x91   :  { %173 = vrsqrt.f32 %v252_v51  ;;  %vm131_vm12 = vcmp.eq.f32.partialorder %v252_v51, inf  ;;  %vm75_vm13 = vcmp.eq.f32.partialorder %v247_v45, 0.0  ;;  %vm126_vm14 = vcmp.eq.f32.partialorder %v250_v50, 0.0 }
  0x92   :  { %v134_v29 = vand.u32 2147483648, %v252_v51  ;;  %vm133_vm15 = vcmp.eq.f32.partialorder %v252_v51, 0.0 }
  0x94   :  { %v160_v52 = vpop.eup %159 }
  0x95   :  { %v162_v55 = vpop.eup %161  ;;  %v51_v56 = vmul.f32 %v160_v52, %v46_v42 }
  0x96   :  { %v164_v58 = vpop.eup %163  ;;  %v58_v59 = vmul.f32 %v162_v55, %v47_v43 }
  0x97   :  { %v166_v61 = vpop.eup %165  ;;  %v53_v62 = vsel %vm52_vm0, %v46_v42, %v51_v56  ;;  %v65_v63 = vmul.f32 %v164_v58, %v48_v44 }
  0x98   :  { %v168_v1 = vpop.eup %167  ;;  %v56_v2 = vsel %vm54_vm1, %v55_v53, %v53_v62  ;;  %v60_v3 = vsel %vm59_vm2, %v47_v43, %v58_v59  ;;  %v72_v4 = vmul.f32 %v166_v61, %v247_v45 }
  0x99   :  { %v170_v5 = vpop.eup %169  ;;  %v63_v6 = vsel %vm61_vm3, %v62_v54, %v60_v3  ;;  %v67_v7 = vsel %vm66_vm4, %v48_v44, %v65_v63  ;;  %v109_v8 = vmul.f32 %v168_v1, %v104_v48 }
  0x9a   :  { %v172_v9 = vpop.eup %171  ;;  %v78_v10 = vadd.f32 %v63_v6, %v56_v2  ;;  %v116_v11 = vmul.f32 %v170_v5, %v105_v49  ;;  %v70_v14 = vsel %vm68_vm5, %v69_v57, %v67_v7  ;;  %v74_v15 = vsel %vm73_vm6, %v247_v45, %v72_v4 }
  0x9b   :  { %v174_v13 = vpop.eup %173  ;;  %v111_v16 = vsel %vm110_vm7, %v104_v48, %v109_v8  ;;  %v123_v17 = vmul.f32 %v172_v9, %v250_v50  ;;  %v77_v27 = vsel %vm75_vm13, %v76_v60, %v74_v15 }
  0x9c   :  { %v79_v18 = vadd.f32 %v78_v10, %v70_v14  ;;  %v114_v19 = vsel %vm112_vm8, %v113_v0, %v111_v16  ;;  %v118_v20 = vsel %vm117_vm9, %v105_v49, %v116_v11  ;;  %v130_v21 = vmul.f32 %v174_v13, %v252_v51 }
  0x9d   :  { %v121_v22 = vsel %vm119_vm10, %v120_v12, %v118_v20  ;;  %v125_v23 = vsel %vm124_vm11, %v250_v50, %v123_v17 }
  0x9e   :  { %v132_v25 = vsel %vm131_vm12, %v252_v51, %v130_v21  ;;  %v136_v26 = vadd.f32 %v121_v22, %v114_v19  ;;  %v128_v28 = vsel %vm126_vm14, %v127_v24, %v125_v23  ;;  %v80_v30 = vadd.f32 %v79_v18, %v77_v27 }
  0x9f   :  { %v135_v32 = vsel %vm133_vm15, %v134_v29, %v132_v25 }
  0xa0   :  { %v137_v31 = vadd.f32 %v136_v26, %v128_v28 }
  0xa2   :  { %v138_v33 = vadd.f32 %v137_v31, %v135_v32 }
  0xa4   :  { %v140_v34 = vadd.f32 %v138_v33, %v80_v30 }
  0xa6   :  { %v146_v35 = vrot.slane %v140_v34, 4 }
  0xa8   :  { %v147_v36 = vadd.f32 %v146_v35, %v140_v34 }
  0xaa   :  { %v148_v37 = vrot.slane %v147_v36, 2 }
  0xac   :  { %v149_v38 = vadd.f32 %v148_v37, %v147_v36 }
  0xae   :  { %v150_v39 = vrot.slane %v149_v38, 1 }
  0xb0   :  { %v151_v40 = vadd.f32 %v150_v39, %v149_v38 }
  0xb2   :  { %152 = vst [vmem:[%s288_s3] sm:$0x1] %v151_v40 }

</bundles_post_ra>
